<compile_context>
chip_gen: v7x
topology: tpu7x:2x2x1
jax: 0.10.0
libtpu: 0.0.40
codegen_flags: <defaults>
</compile_context>

<pallas_src>
import functools

import jax
import jax.numpy as jnp
from jax.experimental import pallas as pl
from jax.experimental.pallas import tpu as pltpu


def _pick_spatial_tile(hw, c, itemsize, budget=2 << 20):
    """Lane-dense spatial tile (multiple of 128, <= hw) whose (C, TS) block is
    at most ~2 MiB; small spatials (< 128) are taken whole."""
    if hw <= 128:
        return hw
    max_lanes = max(128, (budget // max(c * itemsize, 1)) // 128 * 128)
    return min(max_lanes, (hw // 128) * 128)


def channel_attention_kernel(x_ref, w1_ref, w2_ref, o_ref, sum_ref, max_ref,
                             *, hw, ragged, inv_hw):
    # x_ref:   (C, TS)  native dtype, one lane-dense spatial tile of one image
    # w1_ref:  (Cr, C)  fc1 weight (1x1 conv as matrix), VMEM-resident
    # w2_ref:  (C, Cr)  fc2 weight (1x1 conv as matrix), VMEM-resident
    # o_ref:   (C, 1)   f32 attention output, written on the last spatial tile
    # sum_ref: (C, CW)  f32 lane-wide running sum      (VMEM scratch)
    # max_ref: (C, CW)  lane-wide running max (bf16 if x is bf16, else f32)
    s = pl.program_id(1)
    last = pl.num_programs(1) - 1

    C, ts = x_ref.shape
    cw = sum_ref.shape[1]
    nchunks = ts // cw

    @pl.when(s == 0)
    def _init():
        sum_ref[...] = jnp.zeros(sum_ref.shape, jnp.float32)
        max_ref[...] = jnp.full(max_ref.shape, -jnp.inf, dtype=max_ref.dtype)

    xv = x_ref[...]                                   # (C, TS) native dtype

    # Fold the tile into a single (C, CW) lane-wide partial: pure VPU work.
    psum = None
    pmax = None
    for k in range(nchunks):                          # static unroll
        chunk = xv[:, k * cw:(k + 1) * cw]
        c_sum = chunk.astype(jnp.float32)
        c_max = chunk.astype(max_ref.dtype)
        if ragged:
            lane = jax.lax.broadcasted_iota(jnp.int32, (C, cw), 1)
            valid = (s * ts + k * cw + lane) < hw
            c_sum = jnp.where(valid, c_sum, 0.0)
            c_max = jnp.where(valid, c_max,
                              jnp.array(-jnp.inf, dtype=max_ref.dtype))
        psum = c_sum if psum is None else psum + c_sum
        pmax = c_max if pmax is None else jnp.maximum(pmax, c_max)

    # Single accumulate per grid step (no duplicated s==0 / s>0 branches).
    sum_ref[...] = sum_ref[...] + psum
    max_ref[...] = jnp.maximum(max_ref[...], pmax)

    @pl.when(s == last)
    def _finalize():
        # One lanes->1 XLU reduce per image, then the tiny fused MLP.
        avg_col = jnp.sum(sum_ref[...], axis=1, keepdims=True) * inv_hw  # (C,1)
        max_col = jnp.max(max_ref[...], axis=1,
                          keepdims=True).astype(jnp.float32)             # (C,1)
        w1 = w1_ref[...]
        w2 = w2_ref[...]
        h_avg = jnp.maximum(
            jnp.dot(w1, avg_col, preferred_element_type=jnp.float32), 0.0)
        h_max = jnp.maximum(
            jnp.dot(w1, max_col, preferred_element_type=jnp.float32), 0.0)
        # fc2 is linear: fc2(h_avg) + fc2(h_max) == fc2(h_avg + h_max)
        logits = jnp.dot(w2, h_avg + h_max, preferred_element_type=jnp.float32)
        o_ref[...] = (1.0 / (1.0 + jnp.exp(-logits))).astype(o_ref.dtype)


@jax.jit
def channel_attention(x, fc1_w, fc2_w):
    """x: (N, C, H, W); fc1_w: (Cr, C, 1, 1); fc2_w: (C, Cr, 1, 1).
    Returns (N, C, 1, 1) f32 channel-attention weights."""
    N, C, H, W = x.shape
    Cr = fc1_w.shape[0]
    hw = H * W

    xs = x.reshape(N, C, hw)                         # lane axis = spatial
    w1 = fc1_w.reshape(Cr, C)                        # native dtype (no upcast)
    w2 = fc2_w.reshape(C, Cr)

    ts = _pick_spatial_tile(hw, C, jnp.dtype(x.dtype).itemsize)
    cw = min(128, ts)                                # lane-wide accumulator width
    ragged = (hw % ts) != 0
    grid = (N, pl.cdiv(hw, ts))

    # Keep the running max in bf16 when the input is bf16 (native VPU on
    # v6e/v7x); otherwise accumulate max in f32.
    max_dtype = jnp.bfloat16 if x.dtype == jnp.bfloat16 else jnp.float32

    kernel = functools.partial(channel_attention_kernel,
                               hw=hw, ragged=ragged, inv_hw=1.0 / float(hw))

    out = pl.pallas_call(
        kernel,
        out_shape=jax.ShapeDtypeStruct((N, C, 1), jnp.float32),
        grid_spec=pltpu.PrefetchScalarGridSpec(
            num_scalar_prefetch=0,
            grid=grid,
            in_specs=[
                # one lane-dense spatial tile of one image per step
                pl.BlockSpec((None, C, ts), lambda n, s: (n, 0, s)),
                # small MLP weights: constant index -> fetched once, resident
                pl.BlockSpec((Cr, C), lambda n, s: (0, 0)),
                pl.BlockSpec((C, Cr), lambda n, s: (0, 0)),
            ],
            out_specs=pl.BlockSpec((None, C, 1), lambda n, s: (n, 0, 0)),
            scratch_shapes=[
                pltpu.VMEM((C, cw), jnp.float32),    # lane-wide running sum
                pltpu.VMEM((C, cw), max_dtype),      # lane-wide running max
            ],
        ),
        compiler_params=pltpu.CompilerParams(
            dimension_semantics=("parallel", "arbitrary"),
            vmem_limit_bytes=32 * 1024 * 1024,
        ),
    )(xs, w1, w2)
    return out.reshape(N, C, 1, 1)


def channel_attention_reference(x, fc1_w, fc2_w):
    Cr, C = fc1_w.shape[0], fc1_w.shape[1]
    w1 = fc1_w.reshape(Cr, C).astype(jnp.float32)
    w2 = fc2_w.reshape(C, Cr).astype(jnp.float32)
    xf = x.astype(jnp.float32)
    avg = jnp.mean(xf, axis=(2, 3))                  # (N, C)
    mx = jnp.max(xf, axis=(2, 3))                    # (N, C)

    def mlp(v):
        return jnp.maximum(v @ w1.T, 0.0) @ w2.T

    out = jax.nn.sigmoid(mlp(avg) + mlp(mx))         # (N, C)
    return out[:, :, None, None]


if __name__ == "__main__":
    key = jax.random.PRNGKey(0)
    kx, k1, k2 = jax.random.split(key, 3)

    # Small shapes consistent with the module (ratio=8 requires C >= 8).
    N, C, H, W = 2, 32, 16, 16
    ratio = 8
    Cr = C // ratio

    x = jax.random.normal(kx, (N, C, H, W), dtype=jnp.float32)
    fc1_w = 0.2 * jax.random.normal(k1, (Cr, C, 1, 1), dtype=jnp.float32)
    fc2_w = 0.2 * jax.random.normal(k2, (C, Cr, 1, 1), dtype=jnp.float32)

    out = channel_attention(x, fc1_w, fc2_w)
    out = jax.block_until_ready(out)

    ref = channel_attention_reference(x, fc1_w, fc2_w)
    assert out.shape == (N, C, 1, 1), out.shape
    assert jnp.allclose(out, ref, atol=2e-5, rtol=2e-5), float(
        jnp.max(jnp.abs(out - ref)))

    print("KERNEL_OK")
</pallas_src>

<mosaic_0001>
module attributes {stable_mosaic.version = 11 : i64} {
  func.func @channel_attention_kernel(%arg0: i32, %arg1: i32, %arg2: memref<1x32x256xf32, #tpu.memory_space<vmem>>, %arg3: memref<4x32xf32, #tpu.memory_space<vmem>>, %arg4: memref<32x4xf32, #tpu.memory_space<vmem>>, %arg5: memref<1x32x1xf32, #tpu.memory_space<vmem>>, %arg6: memref<32x128xf32, #tpu.memory_space<vmem>>, %arg7: memref<32x128xf32, #tpu.memory_space<vmem>>) attributes {dimension_semantics = [#tpu.dimension_semantics<parallel>, #tpu.dimension_semantics<arbitrary>], iteration_bounds = array<i64: 2, 1>, scalar_prefetch = 0 : i64, scratch_operands = 2 : i64, tpu.core_type = #tpu.core_type<tc>, window_params = [{transform_indices = @transform_0, window_bounds = array<i64: 1, 32, 256>}, {pipeline_mode = #tpu.pipeline_mode<synchronous>, transform_indices = @transform_1, window_bounds = array<i64: 4, 32>}, {pipeline_mode = #tpu.pipeline_mode<synchronous>, transform_indices = @transform_2, window_bounds = array<i64: 32, 4>}, {transform_indices = @transform_3, window_bounds = array<i64: 1, 32, 1>}]} {
    %c0_i32 = arith.constant 0 : i32
    %0 = arith.cmpi eq, %arg1, %c0_i32 : i32
    %1 = arith.extui %0 : i1 to i32
    %c0_i32_0 = arith.constant 0 : i32
    %2 = arith.cmpi ne, %1, %c0_i32_0 : i32
    scf.if %2 {
      %cst = arith.constant 0.000000e+00 : f32
      %18 = vector.broadcast %cst : f32 to vector<32x128xf32>
      %c0_13 = arith.constant 0 : index
      %c0_14 = arith.constant 0 : index
      %19 = vector.load %arg6[%c0_13, %c0_14] : memref<32x128xf32, #tpu.memory_space<vmem>>, vector<32x128xf32>
      tpu.vector_store %arg6[%c0_13, %c0_14], %18 {strides = array<i32>} : memref<32x128xf32, #tpu.memory_space<vmem>>, vector<32x128xf32>,
      %cst_15 = arith.constant 0xFF800000 : f32
      %20 = vector.broadcast %cst_15 : f32 to vector<32x128xf32>
      %c0_16 = arith.constant 0 : index
      %c0_17 = arith.constant 0 : index
      %21 = vector.load %arg7[%c0_16, %c0_17] : memref<32x128xf32, #tpu.memory_space<vmem>>, vector<32x128xf32>
      tpu.vector_store %arg7[%c0_16, %c0_17], %20 {strides = array<i32>} : memref<32x128xf32, #tpu.memory_space<vmem>>, vector<32x128xf32>,
    } else {
    }
    %c0 = arith.constant 0 : index
    %c0_1 = arith.constant 0 : index
    %c0_2 = arith.constant 0 : index
    %3 = vector.load %arg2[%c0, %c0_1, %c0_2] : memref<1x32x256xf32, #tpu.memory_space<vmem>>, vector<1x32x256xf32>
    %4 = vector.shape_cast %3 : vector<1x32x256xf32> to vector<32x256xf32>
    %5 = vector.extract_strided_slice %4 {offsets = [0, 0], sizes = [32, 128], strides = [1, 1]} : vector<32x256xf32> to vector<32x128xf32>
    %6 = vector.extract_strided_slice %4 {offsets = [0, 128], sizes = [32, 128], strides = [1, 1]} : vector<32x256xf32> to vector<32x128xf32>
    %7 = arith.addf %5, %6 : vector<32x128xf32>
    %8 = arith.maximumf %5, %6 : vector<32x128xf32>
    %c0_3 = arith.constant 0 : index
    %c0_4 = arith.constant 0 : index
    %9 = vector.load %arg6[%c0_3, %c0_4] : memref<32x128xf32, #tpu.memory_space<vmem>>, vector<32x128xf32>
    %10 = arith.addf %9, %7 : vector<32x128xf32>
    %c0_5 = arith.constant 0 : index
    %c0_6 = arith.constant 0 : index
    %11 = vector.load %arg6[%c0_5, %c0_6] : memref<32x128xf32, #tpu.memory_space<vmem>>, vector<32x128xf32>
    tpu.vector_store %arg6[%c0_5, %c0_6], %10 {strides = array<i32>} : memref<32x128xf32, #tpu.memory_space<vmem>>, vector<32x128xf32>,
    %c0_7 = arith.constant 0 : index
    %c0_8 = arith.constant 0 : index
    %12 = vector.load %arg7[%c0_7, %c0_8] : memref<32x128xf32, #tpu.memory_space<vmem>>, vector<32x128xf32>
    %13 = arith.maximumf %12, %8 : vector<32x128xf32>
    %c0_9 = arith.constant 0 : index
    %c0_10 = arith.constant 0 : index
    %14 = vector.load %arg7[%c0_9, %c0_10] : memref<32x128xf32, #tpu.memory_space<vmem>>, vector<32x128xf32>
    tpu.vector_store %arg7[%c0_9, %c0_10], %13 {strides = array<i32>} : memref<32x128xf32, #tpu.memory_space<vmem>>, vector<32x128xf32>,
    %c0_i32_11 = arith.constant 0 : i32
    %15 = arith.cmpi eq, %arg1, %c0_i32_11 : i32
    %16 = arith.extui %15 : i1 to i32
    %c0_i32_12 = arith.constant 0 : i32
    %17 = arith.cmpi ne, %16, %c0_i32_12 : i32
    scf.if %17 {
      %c0_13 = arith.constant 0 : index
      %c0_14 = arith.constant 0 : index
      %18 = vector.load %arg6[%c0_13, %c0_14] : memref<32x128xf32, #tpu.memory_space<vmem>>, vector<32x128xf32>
      %cst = arith.constant dense<0.000000e+00> : vector<32xf32>
      %19 = vector.multi_reduction <add>, %18, %cst [1] : vector<32x128xf32> to vector<32xf32>
      %20 = vector.shape_cast %19 : vector<32xf32> to vector<32x1xf32>
      %cst_15 = arith.constant 3.906250e-03 : f32
      %21 = vector.broadcast %cst_15 : f32 to vector<32x1xf32>
      %22 = arith.mulf %20, %21 : vector<32x1xf32>
      %c0_16 = arith.constant 0 : index
      %c0_17 = arith.constant 0 : index
      %23 = vector.load %arg7[%c0_16, %c0_17] : memref<32x128xf32, #tpu.memory_space<vmem>>, vector<32x128xf32>
      %cst_18 = arith.constant dense<0xFF800000> : vector<32xf32>
      %24 = vector.multi_reduction <maximumf>, %23, %cst_18 [1] : vector<32x128xf32> to vector<32xf32>
      %25 = vector.shape_cast %24 : vector<32xf32> to vector<32x1xf32>
      %c0_19 = arith.constant 0 : index
      %c0_20 = arith.constant 0 : index
      %26 = vector.load %arg3[%c0_19, %c0_20] : memref<4x32xf32, #tpu.memory_space<vmem>>, vector<4x32xf32>
      %c0_21 = arith.constant 0 : index
      %c0_22 = arith.constant 0 : index
      %27 = vector.load %arg4[%c0_21, %c0_22] : memref<32x4xf32, #tpu.memory_space<vmem>>, vector<32x4xf32>
      %cst_23 = arith.constant dense<0.000000e+00> : vector<4x1xf32>
      %28 = tpu.matmul %26, %22, %cst_23 {dimension_numbers = #tpu.dot_dimension_numbers<[1], [0], [0], [1], [0, 0, 1, 1], [], []>} : vector<4x32xf32>, vector<32x1xf32>, vector<4x1xf32> -> vector<4x1xf32>
      %cst_24 = arith.constant 0.000000e+00 : f32
      %29 = vector.broadcast %cst_24 : f32 to vector<4x1xf32>
      %30 = arith.maximumf %28, %29 : vector<4x1xf32>
      %cst_25 = arith.constant dense<0.000000e+00> : vector<4x1xf32>
      %31 = tpu.matmul %26, %25, %cst_25 {dimension_numbers = #tpu.dot_dimension_numbers<[1], [0], [0], [1], [0, 0, 1, 1], [], []>} : vector<4x32xf32>, vector<32x1xf32>, vector<4x1xf32> -> vector<4x1xf32>
      %cst_26 = arith.constant 0.000000e+00 : f32
      %32 = vector.broadcast %cst_26 : f32 to vector<4x1xf32>
      %33 = arith.maximumf %31, %32 : vector<4x1xf32>
      %34 = arith.addf %30, %33 : vector<4x1xf32>
      %cst_27 = arith.constant dense<0.000000e+00> : vector<32x1xf32>
      %35 = tpu.matmul %27, %34, %cst_27 {dimension_numbers = #tpu.dot_dimension_numbers<[1], [0], [0], [1], [0, 0, 1, 1], [], []>} : vector<32x4xf32>, vector<4x1xf32>, vector<32x1xf32> -> vector<32x1xf32>
      %cst_28 = arith.constant 0.000000e+00 : f32
      %36 = vector.broadcast %cst_28 : f32 to vector<32x1xf32>
      %37 = arith.subf %36, %35 : vector<32x1xf32>
      %38 = math.exp %37 : vector<32x1xf32>
      %cst_29 = arith.constant 1.000000e+00 : f32
      %39 = vector.broadcast %cst_29 : f32 to vector<32x1xf32>
      %40 = arith.addf %39, %38 : vector<32x1xf32>
      %cst_30 = arith.constant 1.000000e+00 : f32
      %41 = vector.broadcast %cst_30 : f32 to vector<32x1xf32>
      %42 = arith.divf %41, %40 : vector<32x1xf32>
      %c0_31 = arith.constant 0 : index
      %c0_32 = arith.constant 0 : index
      %c0_33 = arith.constant 0 : index
      %43 = vector.load %arg5[%c0_31, %c0_32, %c0_33] : memref<1x32x1xf32, #tpu.memory_space<vmem>>, vector<1x32x1xf32>
      %44 = vector.shape_cast %43 : vector<1x32x1xf32> to vector<32x1xf32>
      %45 = vector.shape_cast %42 : vector<32x1xf32> to vector<1x32x1xf32>
      tpu.vector_store %arg5[%c0_31, %c0_32, %c0_33], %45 {strides = array<i32>} : memref<1x32x1xf32, #tpu.memory_space<vmem>>, vector<1x32x1xf32>,
    } else {
    }
    return
  }
  func.func @transform_0(%arg0: i32, %arg1: i32) -> (i32, i32, i32) {
    %c0_i32 = arith.constant 0 : i32
    %c0_i32_0 = arith.constant 0 : i32
    return %arg0, %c0_i32, %arg1 : i32, i32, i32
  }
  func.func @transform_1(%arg0: i32, %arg1: i32) -> (i32, i32) {
    %c0_i32 = arith.constant 0 : i32
    %c0_i32_0 = arith.constant 0 : i32
    %c0_i32_1 = arith.constant 0 : i32
    return %c0_i32, %c0_i32_0 : i32, i32
  }
  func.func @transform_2(%arg0: i32, %arg1: i32) -> (i32, i32) {
    %c0_i32 = arith.constant 0 : i32
    %c0_i32_0 = arith.constant 0 : i32
    %c0_i32_1 = arith.constant 0 : i32
    return %c0_i32, %c0_i32_0 : i32, i32
  }
  func.func @transform_3(%arg0: i32, %arg1: i32) -> (i32, i32, i32) {
    %c0_i32 = arith.constant 0 : i32
    %c0_i32_0 = arith.constant 0 : i32
    %c0_i32_1 = arith.constant 0 : i32
    return %arg0, %c0_i32, %c0_i32_0 : i32, i32, i32
  }
}

</mosaic_0001>

<bundles_post_ra>
// kernel: channel_attention.1
= control target key start
LH: loop header
LB: loop body
LE: loop exit
PB: predicated region body
PF: predicated region fallthrough
CT: control target
= control target key end

     0   :  { %s803_s12 = smov 0   ;;  %s805_s13 = smov 0   ;;  %s859_s0 = inlined_call_operand.vmem [shape: f32[2,32,256], index: 0, kind: input, shape index: {}]   ;;  %s860_s1 = inlined_call_operand.vmem [shape: f32[4,32], index: 1, kind: input, shape index: {}]   ;;  %s861_s2 = inlined_call_operand.vmem [shape: f32[32,4], index: 2, kind: input, shape index: {}]   ;;  %s862_s3 = inlined_call_operand.vmem [shape: f32[2,32,1], index: 3, kind: output, shape index: {}]  }
   0x1   :  { %s807_s14 = smov 0  }
   0x2 LB: > { %s25_s15 = sadd.s32 1, %s774_s13  ;;  %p638_p0 = scmp.ge.s32.totalorder %s778_s14, 1  ;;  %s778_s14 = sphi %s807_s14, %s13_s14   ;;  %s774_s13 = sphi %s805_s13, %s864_s13   ;;  %s770_s12 = sphi %s803_s12, %s863_s12  }
   0x3   : > { %p27_p1 = scmp.ge.s32.totalorder %s25_s15, 2  ;;  %p156_p2 = scmp.lt.s32.totalorder %s778_s14, 3 }
   0x5   : > { %s866_s15 = smov (%p27_p1, %s25_s15), 0  ;;  %p157_p3 = pnand %p638_p0, %p156_p2 }
   0x6   : > { %p185_p4 = scmp.lt.s32.totalorder (!%p157_p3), %s770_s12, 1  ;;  %v780_v16 = vmov (!%p157_p3), 0.0|0.0   ;;  %vm781_vm0 = vmmov (!%p157_p3), 0   ;;  %v782_v17 = vmov (!%p157_p3), 0.0   ;;  %v282_v34 = vld [vmem:[%s860_s1] sm:$0xf] (!%p157_p3) }
   0x7   : > { %160 = sbr.rel (%p157_p3) target bundleno = 641 (0x281), region = 32  ;;  %705 = vmatprep.subr.bf16.mxu1 (!%p157_p3), %v780_v16  ;;  %699 = vmatprep.subr.bf16.mxu0 (!%p157_p3), %v780_v16  ;;  %vm287_vm1 = vcmask (!%p157_p3), 261120   ;;  %v283_v35 = vld [vmem:[%s861_s2] sm:$0xff] (!%p157_p3)  ;;  %vm434_vm2 = vcmask (!%p157_p3), 31744   ;;  %v285_v36 = vld [vmem:[%s861_s2 + $0x10] sm:$0xff] (!%p157_p3)  ;;  %vm447_vm3 = vcmask (!%p157_p3), 1043456  }
   0x8   : > { %677 = vmatprep.mubr.msk.f32.mxu0 (!%p157_p3), %vm781_vm0, %v782_v17  ;;  %688 = vmatprep.mubr.msk.f32.mxu1 (!%p157_p3), %vm781_vm0, %v782_v17  ;;  %v284_v44 = vld [vmem:[%s861_s2 + $0x8] sm:$0xff] (!%p157_p3)  ;;  %v286_v45 = vld [vmem:[%s861_s2 + $0x18] sm:$0xff] (!%p157_p3)  ;;  %vm560_vm4 = vcmask (!%p157_p3), 7168  }
   0xe   : > { %s868_s12 = smov (!%p185_p4, %s770_s12), 1 }
   0xf   : > { %s652_s16 = sshll.u32 %s868_s12, 6  ;;  %s653_s30 = sshll.u32 %s868_s12, 5 }
  0x10   : > { %s192_s19 = scalar_lea.vmem %s859_s0, %s652_s16  ;;  %s198_s6 = scalar_lea.vmem %s862_s3, %s653_s30 }
  0x11   : > { %v211_v0 = vld [vmem:[%s192_s19] sm:$0xff]  ;;  %v212_v1 = vld [vmem:[%s192_s19 + $0x8] sm:$0xff]  ;;  %v213_v2 = vld [vmem:[%s192_s19 + $0x10] sm:$0xff] }
  0x12   : > { %v223_v3 = vmax.f32 %v211_v0, %v212_v1  ;;  %v219_v4 = vadd.f32 %v212_v1, %v211_v0  ;;  %v214_v5 = vld [vmem:[%s192_s19 + $0x18] sm:$0xff]  ;;  %v217_v8 = vld [vmem:[%s192_s19 + $0x30] sm:$0xff]  ;;  %v215_v10 = vld [vmem:[%s192_s19 + $0x20] sm:$0xff] }
  0x13   : > { %v224_v6 = vmax.f32 %v213_v2, %v214_v5  ;;  %v220_v7 = vadd.f32 %v214_v5, %v213_v2  ;;  %v218_v9 = vld [vmem:[%s192_s19 + $0x38] sm:$0xff]  ;;  %v216_v11 = vld [vmem:[%s192_s19 + $0x28] sm:$0xff] }
  0x14   : > { %274 = vmax.xlane.f32.xlu1 %v223_v3  ;;  %258 = vadd.xlane.f32.xlu0 %v219_v4  ;;  %v222_v12 = vadd.f32 %v218_v9, %v217_v8  ;;  %v221_v13 = vadd.f32 %v216_v11, %v215_v10  ;;  %v226_v14 = vmax.f32 %v217_v8, %v218_v9 }
  0x15   : > { %v225_v15 = vmax.f32 %v215_v10, %v216_v11 }
  0x18   : > { %276 = vmax.xlane.f32.xlu1 %v224_v6  ;;  %260 = vadd.xlane.f32.xlu0 %v220_v7 }
  0x1c   : > { %264 = vadd.xlane.f32.xlu1 %v222_v12  ;;  %262 = vadd.xlane.f32.xlu0 %v221_v13 }
  0x20   : > { %280 = vmax.xlane.f32.xlu1 %v226_v14  ;;  %278 = vmax.xlane.f32.xlu0 %v225_v15 }
  0xa1   : > { %v275_v18 = vpop.xlane.xlu1 %274  ;;  %v259_v19 = vpop.xlane.xlu0 %258 }
  0xa2   : > { %v266_v22 = vmul.f32 0.00390625, %v259_v19 }
  0xa5   : > { %v277_v20 = vpop.xlane.xlu1 %276  ;;  %v261_v21 = vpop.xlane.xlu0 %260 }
  0xa6   : > { %v706_v23 = vpack.c.bf16 %v277_v20, %v275_v18  ;;  %v267_v24 = vmul.f32 0.00390625, %v261_v21 }
  0xa8   : > { %707 = vmatpush3.bf16.msra.mxu1 %v706_v23  ;;  %v700_v25 = vpack.c.bf16 %v267_v24, %v266_v22 }
  0xa9   : > { %v265_v26 = vpop.xlane.xlu1 %264  ;;  %v263_v27 = vpop.xlane.xlu0 %262  ;;  %708 = vmatprep.subr.bf16.mxu1 %v780_v16 }
  0xaa   : > { %v269_v28 = vmul.f32 0.00390625, %v265_v26  ;;  %v268_v29 = vmul.f32 0.00390625, %v263_v27  ;;  %701 = vmatpush3.bf16.msra.mxu0 %v700_v25 }
  0xab   : > { %702 = vmatprep.subr.bf16.mxu0 %v780_v16 }
  0xac   : > { %v703_v30 = vpack.c.bf16 %v269_v28, %v268_v29 }
  0xad   : > { %v281_v31 = vpop.xlane.xlu1 %280  ;;  %v279_v32 = vpop.xlane.xlu0 %278 }
  0xae   : > { %v709_v33 = vpack.c.bf16 %v281_v31, %v279_v32  ;;  %704 = vmatpush3.bf16.msra.mxu0 %v703_v30 }
  0xb0   : > { %710 = vmatpush3.bf16.msra.mxu1 %v709_v33 }
  0xb1   : > { %678 = vmatmul.mubr.msk.f32.vlgmr.msra.gmra.mrb[0].mxu0 %vm287_vm1, %v282_v34 }
  0xb2   : > { %693 = vmatprep.mubr.msk.f32.mxu0 %vm434_vm2, %v283_v35 }
  0xb3   : > { %689 = vmatmul.mubr.msk.f32.vlgmr.msra.gmra.mrb[0].mxu1 %vm287_vm1, %v282_v34 }
  0xb4   : > { %696 = vmatprep.mubr.msk.f32.mxu1 %vm434_vm2, %v285_v36 }
 0x184   : > { %v357_v37 = vpop.f32.mrb[0].mxu0 }
 0x185   : > { %v361_v38 = vmax.f32 %v357_v37, 0.0  ;;  %v679_v39 = vpop.f32.mrb[1].mxu0 }
 0x186   : > { %v428_v40 = vpop.f32.mrb[0].mxu1 }
 0x187   : > { %v432_v41 = vmax.f32 %v428_v40, 0.0  ;;  %v690_v42 = vpop.f32.mrb[1].mxu1 }
 0x189   : > { %v433_v43 = vadd.f32 %v432_v41, %v361_v38 }
 0x18b   : > { %691 = vmatprep.subr.msk.mxu0 %vm447_vm3, %v433_v43  ;;  %711 = vmatprep.subr.msk.mxu1 %vm447_vm3, %v433_v43 }
 0x18c   : > { %692 = vmatpush3.msk.msra.mxu0 %vm447_vm3, %v433_v43  ;;  %712 = vmatpush3.msk.msra.mxu1 %vm447_vm3, %v433_v43 }
 0x18d   : > { %694 = vmatmul.mubr.msk.f32.vlgmr.msra.gmra.mrb[2].mxu0 %vm434_vm2, %v284_v44  ;;  %697 = vmatmul.mubr.msk.f32.vlgmr.msra.gmra.mrb[2].mxu1 %vm434_vm2, %v286_v45 }
 0x260   : > { %v695_v46 = vpop.f32.mrb[2].mxu0  ;;  %v698_v47 = vpop.f32.mrb[2].mxu1 }
 0x261   : > { %v537_v48 = vsub.f32 0.0, %v695_v46  ;;  %v539_v49 = vsub.f32 0.0, %v698_v47  ;;  %v517_v50 = vpop.f32.mrb[3].mxu0  ;;  %v527_v51 = vpop.f32.mrb[3].mxu1 }
 0x262   : > { %v536_v52 = vsub.f32 0.0, %v517_v50  ;;  %v538_v53 = vsub.f32 0.0, %v527_v51 }
 0x263   : > { %v542_v54 = vmul.f32 1.442695, %v537_v48  ;;  %v546_v55 = vmul.f32 1.442695, %v539_v49 }
 0x264   : > { %v540_v56 = vmul.f32 1.442695, %v536_v52  ;;  %v544_v57 = vmul.f32 1.442695, %v538_v53 }
 0x265   : > { %740 = vpow2.f32 %v542_v54 }
 0x266   : > { %742 = vpow2.f32 %v546_v55 }
 0x267   : > { %744 = vpow2.f32 %v540_v56 }
 0x268   : > { %746 = vpow2.f32 %v544_v57 }
 0x26f   : > { %v741_v58 = vpop.eup %740 }
 0x270   : > { %v743_v59 = vpop.eup %742  ;;  %v549_v60 = vadd.f32 1.0, %v741_v58 }
 0x271   : > { %v745_v61 = vpop.eup %744  ;;  %v551_v62 = vadd.f32 1.0, %v743_v59 }
 0x272   : > { %v747_v63 = vpop.eup %746  ;;  %748 = vrcp.f32 %v549_v60  ;;  %v548_v0 = vadd.f32 1.0, %v745_v61 }
 0x273   : > { %750 = vrcp.f32 %v551_v62  ;;  %v550_v1 = vadd.f32 1.0, %v747_v63 }
 0x274   : > { %752 = vrcp.f32 %v548_v0 }
 0x275   : > { %754 = vrcp.f32 %v550_v1 }
 0x27c   : > { %v749_v2 = vpop.eup %748 }
 0x27d   : > { %v751_v3 = vpop.eup %750  ;;  %562 = vst.msk [vmem:[%s198_s6 + $0x8] sm:$0xff] %vm560_vm4, %v749_v2 }
 0x27e   : > { %v753_v4 = vpop.eup %752  ;;  %564 = vst.msk [vmem:[%s198_s6 + $0x18] sm:$0xff] %vm560_vm4, %v751_v3 }
 0x27f   : > { %v755_v5 = vpop.eup %754  ;;  %561 = vst.msk [vmem:[%s198_s6] sm:$0xff] %vm560_vm4, %v753_v4 }
 0x280   : > { %563 = vst.msk [vmem:[%s198_s6 + $0x10] sm:$0xff] %vm560_vm4, %v755_v5 }
 0x281 PF: > { %s13_s14 = sadd.s32 1, %s778_s14   ;;  %s863_s12 = smov %s774_s13 }
 0x282   : > { %p10_p5 = scmp.ge.s32.totalorder %s13_s14, 4   ;;  %s864_s13 = smov %s866_s15 }
 0x284   :  { %12 = sbr.rel (!%p10_p5) target bundleno = 2 (0x2), region = 70 }

</bundles_post_ra>
